<compile_context>
chip_gen: v6e
topology: v6e:2x2x1
jax: 0.10.0
libtpu: 0.0.40
codegen_flags: <defaults>
</compile_context>

<pallas_src>
import jax
import jax.numpy as jnp
from jax.experimental import pallas as pl
from jax.experimental.pallas import tpu as pltpu

# ---- small, self-consistent shapes (module defaults scaled down) ----
B = 4            # batch
S = 16           # sentence_max_size
D = 32           # vec_dim
F = 8            # filter_num
L = 2            # label_size
KERNELS = (3, 4, 5)

KMAX = max(KERNELS)
K_MAIN_OFFS = 4                        # offsets 0..3 -> main im2col slab, K = 4*D = 128 lanes
K_TAIL_OFFS = KMAX - K_MAIN_OFFS       # 1 remaining offset -> small K = D accumulate matmul
S_OUT_PAD = 16                         # kept position rows (14 real + 2 padded), 8-sublane aligned
S_PAD = S_OUT_PAD + KMAX - 1           # 20: x padded along S so every shift is in-bounds
NF = F * len(KERNELS)                  # 24 concatenated filter outputs
FPAD = ((NF + 127) // 128) * 128       # 128: lane-dense filter dim
LPAD = ((L + 127) // 128) * 128        # 128: lane-dense label dim

assert K_MAIN_OFFS * D == 128, "main im2col slab is sized to be exactly 128 lanes"


def textcnn_kernel(x_ref, wmain_ref, wtail_ref, mb_ref, fcw_ref, fcb_ref, out_ref):
    """One grid step: (BLOCK_B, S_PAD, D) bf16 batch tile -> (BLOCK_B, LPAD) f32 logits."""
    bb, _, d = x_ref.shape
    m = bb * S_OUT_PAD
    x = x_ref[...]                                                   # bf16

    # Main im2col slab: offsets 0..3 -> (M, 4*D) = (M, 128), exact lane multiple.
    slab = jnp.concatenate(
        [x[:, o:o + S_OUT_PAD, :] for o in range(K_MAIN_OFFS)], axis=-1)
    slab = slab.reshape(m, K_MAIN_OFFS * d)
    acts = jnp.dot(slab, wmain_ref[...], preferred_element_type=jnp.float32)

    # Tail offset 4 (feeds only the k=5 branch columns): small K=D accumulate matmul.
    for o in range(K_MAIN_OFFS, KMAX):
        tail = x[:, o:o + S_OUT_PAD, :].reshape(m, d)
        acts += jnp.dot(tail, wtail_ref[...], preferred_element_type=jnp.float32)

    # Conv bias + validity mask are fused into mb_ref (bias on valid rows, -1e30 on invalid
    # rows). ReLU clips invalid rows to 0, which never beats a valid (>= 0) activation.
    acts = jnp.maximum(acts + mb_ref[...], 0.0)

    # MaxPool2d((S - k + 1, 1)) per branch == max over the (8-aligned) position axis.
    pooled = jnp.max(acts.reshape(bb, S_OUT_PAD, FPAD), axis=1)      # (bb, FPAD) f32

    # TODO(synk): F.dropout is stochastic; implemented as identity (inference semantics).
    out = jnp.dot(pooled.astype(fcw_ref.dtype), fcw_ref[...],
                  preferred_element_type=jnp.float32) + fcb_ref[...]
    out_ref[...] = out


def _pack_params(params):
    """Host-side layout plumbing: fuse conv branches into lane-dense bf16 weight slabs."""
    wmain_cols, wtail_cols, bias_cols = [], [], []
    for (w, b), k in zip(params["convs"], KERNELS):
        wp = jnp.zeros((KMAX, D, F), jnp.float32).at[:k].set(w)      # zero rows for o >= k
        wmain_cols.append(wp[:K_MAIN_OFFS])                          # (4, D, F)
        wtail_cols.append(wp[K_MAIN_OFFS:])                          # (1, D, F)
        bias_cols.append(b.reshape(1, F))
    wmain = jnp.concatenate(wmain_cols, axis=-1).reshape(K_MAIN_OFFS * D, NF)   # (128, 3F)
    wtail = jnp.concatenate(wtail_cols, axis=-1).reshape(K_TAIL_OFFS * D, NF)   # (32, 3F)
    wmain = jnp.pad(wmain, ((0, 0), (0, FPAD - NF))).astype(jnp.bfloat16)
    wtail = jnp.pad(wtail, ((0, 0), (0, FPAD - NF))).astype(jnp.bfloat16)
    bias = jnp.pad(jnp.concatenate(bias_cols, axis=-1), ((0, 0), (0, FPAD - NF)))  # (1, FPAD) f32
    fcw, fcb = params["fc"]
    fcw_pad = jnp.pad(fcw, ((0, FPAD - NF), (0, LPAD - L))).astype(jnp.bfloat16)
    fcb_pad = jnp.pad(fcb.reshape(1, L), ((0, 0), (0, LPAD - L)))    # (1, LPAD) f32
    return wmain, wtail, bias, fcw_pad, fcb_pad


def _make_maskbias(bias_row, block_b):
    """Resident (block_b*S_OUT_PAD, FPAD) slab: conv bias on valid rows, -1e30 on rows
    invalid under each branch's kernel size (including the 2 sublane-padding rows)."""
    cols = []
    for j, k in enumerate(KERNELS):
        valid = (jnp.arange(S_OUT_PAD) < (S - k + 1))[:, None]
        branch_bias = bias_row[0, j * F:(j + 1) * F][None, :]
        cols.append(jnp.where(valid, branch_bias, -1e30))
    mb = jnp.concatenate(cols, axis=-1)                              # (S_OUT_PAD, 3F)
    mb = jnp.pad(mb, ((0, 0), (0, FPAD - NF)))                       # padded filter lanes stay 0
    return jnp.tile(mb, (block_b, 1)).astype(jnp.float32)            # (block_b*S_OUT_PAD, FPAD)


def textcnn_forward(x, params, block_b=None):
    b, s, d = x.shape
    assert (s, d) == (S, D)
    if block_b is None:
        # Tiny batches: one fat grid step (launch/overhead bound regime).
        # Production: block_b=8 -> M=128 (full v5e MXU pass); 16 -> M=256 for v6e/v7x.
        block_b = b if b <= 8 else 8
    assert b % block_b == 0
    nb = b // block_b
    assert nb == 1 or block_b % 8 == 0   # keep multi-step output blocks 8-sublane aligned

    x_pad = jnp.pad(x, ((0, 0), (0, S_PAD - S), (0, 0))).astype(jnp.bfloat16)
    wmain, wtail, bias, fcw_pad, fcb_pad = _pack_params(params)
    mb = _make_maskbias(bias, block_b)
    m = block_b * S_OUT_PAD

    flops = nb * (2 * m * (K_MAIN_OFFS * D) * FPAD
                  + 2 * m * (K_TAIL_OFFS * D) * FPAD
                  + 2 * block_b * FPAD * LPAD)
    bytes_accessed = int(x_pad.size) * 2 + int(wmain.size) * 2 + int(wtail.size) * 2 \
        + int(mb.size) * 4 + int(fcw_pad.size) * 2 + int(fcb_pad.size) * 4 + b * LPAD * 4

    const2 = lambda i: (0, 0)   # weights / bias-mask resident across the whole grid
    out = pl.pallas_call(
        textcnn_kernel,
        out_shape=jax.ShapeDtypeStruct((b, LPAD), jnp.float32),
        grid_spec=pltpu.PrefetchScalarGridSpec(
            num_scalar_prefetch=0,
            grid=(nb,),
            in_specs=[
                pl.BlockSpec((block_b, S_PAD, D), lambda i: (i, 0, 0)),    # batch tile
                pl.BlockSpec((K_MAIN_OFFS * D, FPAD), const2),             # main conv weight slab
                pl.BlockSpec((K_TAIL_OFFS * D, FPAD), const2),             # tail conv weight slab
                pl.BlockSpec((m, FPAD), const2),                           # fused bias + validity mask
                pl.BlockSpec((FPAD, LPAD), const2),                        # fc weight
                pl.BlockSpec((1, LPAD), const2),                           # fc bias
            ],
            out_specs=pl.BlockSpec((block_b, LPAD), lambda i: (i, 0)),
        ),
        compiler_params=pltpu.CompilerParams(
            dimension_semantics=("parallel",)),
        cost_estimate=pl.CostEstimate(flops=flops, transcendentals=0,
                                      bytes_accessed=bytes_accessed),
    )(x_pad, wmain, wtail, mb, fcw_pad, fcb_pad)
    return out[:, :L]


def textcnn_reference(x, params):
    """Pure-JAX f32 reference mirroring the PyTorch forward (dropout as identity)."""
    feats = []
    for (w, b), k in zip(params["convs"], KERNELS):
        s_out = S - k + 1
        acc = jnp.zeros((x.shape[0], s_out, F), jnp.float32)
        for o in range(k):
            acc += jnp.einsum("bsd,df->bsf", x[:, o:o + s_out, :], w[o])
        acc = jnp.maximum(acc + b[None, :, :], 0.0)
        feats.append(jnp.max(acc, axis=1))                     # (B, F)
    feat = jnp.concatenate(feats, axis=-1)                     # (B, 3F)
    fcw, fcb = params["fc"]
    return feat @ fcw + fcb


def init_params(key):
    keys = jax.random.split(key, 2 * len(KERNELS) + 2)
    convs = []
    for i, k in enumerate(KERNELS):
        w = jax.random.normal(keys[2 * i], (k, D, F), jnp.float32) * 0.05
        b = jax.random.normal(keys[2 * i + 1], (1, F), jnp.float32) * 0.05
        convs.append((w, b))
    fcw = jax.random.normal(keys[-2], (F * len(KERNELS), L), jnp.float32) * 0.05
    fcb = jax.random.normal(keys[-1], (1, L), jnp.float32) * 0.05
    return {"convs": convs, "fc": (fcw, fcb)}


if __name__ == "__main__":
    key = jax.random.PRNGKey(0)
    k_x, k_p = jax.random.split(key)
    x = jax.random.normal(k_x, (B, S, D), jnp.float32)   # torch input (B, 1, S, D), channel squeezed
    params = init_params(k_p)

    out = textcnn_forward(x, params)
    out = jax.block_until_ready(out)

    ref = textcnn_reference(x, params)
    assert out.shape == (B, L)
    # Tolerance accounts for bf16 matmul operands (f32 accumulation) vs the f32 reference.
    assert jnp.allclose(out, ref, atol=2e-2, rtol=2e-2), (out, ref)

    print("KERNEL_OK")
</pallas_src>

<mosaic_0001>
module attributes {stable_mosaic.version = 11 : i64} {
  func.func @textcnn_kernel(%arg0: i32, %arg1: memref<4x20x32xbf16, #tpu.memory_space<vmem>>, %arg2: memref<128x128xbf16, #tpu.memory_space<vmem>>, %arg3: memref<32x128xbf16, #tpu.memory_space<vmem>>, %arg4: memref<64x128xf32, #tpu.memory_space<vmem>>, %arg5: memref<128x128xbf16, #tpu.memory_space<vmem>>, %arg6: memref<1x128xf32, #tpu.memory_space<vmem>>, %arg7: memref<4x128xf32, #tpu.memory_space<vmem>>) attributes {dimension_semantics = [#tpu.dimension_semantics<parallel>], iteration_bounds = array<i64: 1>, scalar_prefetch = 0 : i64, scratch_operands = 0 : i64, tpu.core_type = #tpu.core_type<tc>, window_params = [{transform_indices = @transform_0, window_bounds = array<i64: 4, 20, 32>}, {pipeline_mode = #tpu.pipeline_mode<synchronous>, transform_indices = @transform_1, window_bounds = array<i64: 128, 128>}, {pipeline_mode = #tpu.pipeline_mode<synchronous>, transform_indices = @transform_2, window_bounds = array<i64: 32, 128>}, {pipeline_mode = #tpu.pipeline_mode<synchronous>, transform_indices = @transform_3, window_bounds = array<i64: 64, 128>}, {pipeline_mode = #tpu.pipeline_mode<synchronous>, transform_indices = @transform_4, window_bounds = array<i64: 128, 128>}, {pipeline_mode = #tpu.pipeline_mode<synchronous>, transform_indices = @transform_5, window_bounds = array<i64: 1, 128>}, {transform_indices = @transform_6, window_bounds = array<i64: 4, 128>}]} {
    %c0 = arith.constant 0 : index
    %c0_0 = arith.constant 0 : index
    %c0_1 = arith.constant 0 : index
    %0 = vector.load %arg1[%c0, %c0_0, %c0_1] : memref<4x20x32xbf16, #tpu.memory_space<vmem>>, vector<4x20x32xbf16>
    %1 = vector.extract_strided_slice %0 {offsets = [0, 0, 0], sizes = [4, 16, 32], strides = [1, 1, 1]} : vector<4x20x32xbf16> to vector<4x16x32xbf16>
    %2 = vector.extract_strided_slice %0 {offsets = [0, 1, 0], sizes = [4, 16, 32], strides = [1, 1, 1]} : vector<4x20x32xbf16> to vector<4x16x32xbf16>
    %3 = vector.extract_strided_slice %0 {offsets = [0, 2, 0], sizes = [4, 16, 32], strides = [1, 1, 1]} : vector<4x20x32xbf16> to vector<4x16x32xbf16>
    %4 = vector.extract_strided_slice %0 {offsets = [0, 3, 0], sizes = [4, 16, 32], strides = [1, 1, 1]} : vector<4x20x32xbf16> to vector<4x16x32xbf16>
    %5 = tpu.concatenate %1, %2, %3, %4 in 2 : vector<4x16x32xbf16>, vector<4x16x32xbf16>, vector<4x16x32xbf16>, vector<4x16x32xbf16> -> vector<4x16x128xbf16>
    %6 = vector.shape_cast %5 : vector<4x16x128xbf16> to vector<64x128xbf16>
    %c0_2 = arith.constant 0 : index
    %c0_3 = arith.constant 0 : index
    %7 = vector.load %arg2[%c0_2, %c0_3] : memref<128x128xbf16, #tpu.memory_space<vmem>>, vector<128x128xbf16>
    %cst = arith.constant dense<0.000000e+00> : vector<64x128xf32>
    %8 = tpu.matmul %6, %7, %cst {dimension_numbers = #tpu.dot_dimension_numbers<[1], [0], [0], [1], [0, 0, 1, 1], [], []>} : vector<64x128xbf16>, vector<128x128xbf16>, vector<64x128xf32> -> vector<64x128xf32>
    %9 = vector.extract_strided_slice %0 {offsets = [0, 4, 0], sizes = [4, 16, 32], strides = [1, 1, 1]} : vector<4x20x32xbf16> to vector<4x16x32xbf16>
    %10 = vector.shape_cast %9 : vector<4x16x32xbf16> to vector<64x32xbf16>
    %c0_4 = arith.constant 0 : index
    %c0_5 = arith.constant 0 : index
    %11 = vector.load %arg3[%c0_4, %c0_5] : memref<32x128xbf16, #tpu.memory_space<vmem>>, vector<32x128xbf16>
    %cst_6 = arith.constant dense<0.000000e+00> : vector<64x128xf32>
    %12 = tpu.matmul %10, %11, %cst_6 {dimension_numbers = #tpu.dot_dimension_numbers<[1], [0], [0], [1], [0, 0, 1, 1], [], []>} : vector<64x32xbf16>, vector<32x128xbf16>, vector<64x128xf32> -> vector<64x128xf32>
    %13 = arith.addf %8, %12 : vector<64x128xf32>
    %c0_7 = arith.constant 0 : index
    %c0_8 = arith.constant 0 : index
    %14 = vector.load %arg4[%c0_7, %c0_8] : memref<64x128xf32, #tpu.memory_space<vmem>>, vector<64x128xf32>
    %15 = arith.addf %13, %14 : vector<64x128xf32>
    %cst_9 = arith.constant 0.000000e+00 : f32
    %16 = vector.broadcast %cst_9 : f32 to vector<64x128xf32>
    %17 = arith.maximumf %15, %16 : vector<64x128xf32>
    %18 = vector.shape_cast %17 : vector<64x128xf32> to vector<4x16x128xf32>
    %cst_10 = arith.constant dense<0xFF800000> : vector<4x128xf32>
    %19 = vector.multi_reduction <maximumf>, %18, %cst_10 [1] : vector<4x16x128xf32> to vector<4x128xf32>
    %20 = arith.truncf %19 : vector<4x128xf32> to vector<4x128xbf16>
    %c0_11 = arith.constant 0 : index
    %c0_12 = arith.constant 0 : index
    %21 = vector.load %arg5[%c0_11, %c0_12] : memref<128x128xbf16, #tpu.memory_space<vmem>>, vector<128x128xbf16>
    %cst_13 = arith.constant dense<0.000000e+00> : vector<4x128xf32>
    %22 = tpu.matmul %20, %21, %cst_13 {dimension_numbers = #tpu.dot_dimension_numbers<[1], [0], [0], [1], [0, 0, 1, 1], [], []>} : vector<4x128xbf16>, vector<128x128xbf16>, vector<4x128xf32> -> vector<4x128xf32>
    %c0_14 = arith.constant 0 : index
    %c0_15 = arith.constant 0 : index
    %23 = vector.load %arg6[%c0_14, %c0_15] : memref<1x128xf32, #tpu.memory_space<vmem>>, vector<1x128xf32>
    %24 = vector.broadcast %23 : vector<1x128xf32> to vector<4x128xf32>
    %25 = arith.addf %22, %24 : vector<4x128xf32>
    %c0_16 = arith.constant 0 : index
    %c0_17 = arith.constant 0 : index
    %26 = vector.load %arg7[%c0_16, %c0_17] : memref<4x128xf32, #tpu.memory_space<vmem>>, vector<4x128xf32>
    tpu.vector_store %arg7[%c0_16, %c0_17], %25 {strides = array<i32>} : memref<4x128xf32, #tpu.memory_space<vmem>>, vector<4x128xf32>,
    return
  }
  func.func @transform_0(%arg0: i32) -> (i32, i32, i32) {
    %c0_i32 = arith.constant 0 : i32
    %c0_i32_0 = arith.constant 0 : i32
    %c0_i32_1 = arith.constant 0 : i32
    return %arg0, %c0_i32, %c0_i32_0 : i32, i32, i32
  }
  func.func @transform_1(%arg0: i32) -> (i32, i32) {
    %c0_i32 = arith.constant 0 : i32
    %c0_i32_0 = arith.constant 0 : i32
    %c0_i32_1 = arith.constant 0 : i32
    return %c0_i32, %c0_i32_0 : i32, i32
  }
  func.func @transform_2(%arg0: i32) -> (i32, i32) {
    %c0_i32 = arith.constant 0 : i32
    %c0_i32_0 = arith.constant 0 : i32
    %c0_i32_1 = arith.constant 0 : i32
    return %c0_i32, %c0_i32_0 : i32, i32
  }
  func.func @transform_3(%arg0: i32) -> (i32, i32) {
    %c0_i32 = arith.constant 0 : i32
    %c0_i32_0 = arith.constant 0 : i32
    %c0_i32_1 = arith.constant 0 : i32
    return %c0_i32, %c0_i32_0 : i32, i32
  }
  func.func @transform_4(%arg0: i32) -> (i32, i32) {
    %c0_i32 = arith.constant 0 : i32
    %c0_i32_0 = arith.constant 0 : i32
    %c0_i32_1 = arith.constant 0 : i32
    return %c0_i32, %c0_i32_0 : i32, i32
  }
  func.func @transform_5(%arg0: i32) -> (i32, i32) {
    %c0_i32 = arith.constant 0 : i32
    %c0_i32_0 = arith.constant 0 : i32
    %c0_i32_1 = arith.constant 0 : i32
    return %c0_i32, %c0_i32_0 : i32, i32
  }
  func.func @transform_6(%arg0: i32) -> (i32, i32) {
    %c0_i32 = arith.constant 0 : i32
    %c0_i32_0 = arith.constant 0 : i32
    return %arg0, %c0_i32 : i32, i32
  }
}

</mosaic_0001>

<bundles_post_ra>
// kernel: tpu_custom_call.1
= control target key start
LH: loop header
LB: loop body
LE: loop exit
PB: predicated region body
PF: predicated region fallthrough
CT: control target
= control target key end

     0   :  { %11 = vsyncpa [#allocation3], 0  ;;  %s1224_s0 = inlined_call_operand.vmem [shape: bf16[4,20,32], index: 0, kind: input, shape index: {}]   ;;  %s1225_s1 = inlined_call_operand.vmem [shape: bf16[128,128], index: 1, kind: input, shape index: {}]   ;;  %s1226_s2 = inlined_call_operand.vmem [shape: bf16[32,128], index: 2, kind: input, shape index: {}]   ;;  %s1227_s3 = inlined_call_operand.hbm [shape: f32[64,128], index: 3, kind: input, shape index: {}]   ;;  %s1228_s4 = inlined_call_operand.hbm [shape: bf16[128,128], index: 4, kind: input, shape index: {}]   ;;  %s1229_s5 = inlined_call_operand.vmem [shape: f32[1,128], index: 5, kind: input, shape index: {}]   ;;  %s1230_s6 = inlined_call_operand.hbm [shape: f32[4,128], index: 6, kind: output, shape index: {}]  }
   0x1   :  { %12 = vsyncpa [#allocation6], 0 }
   0x2   :  { %13 = vsyncpa [#allocation4], 0  ;;  %s941_s21 = smov [#allocation2]  }
   0x3   :  { %s25_s22 = sshll.u32 %s941_s21, 4  ;;  %s26_s22 = int_to_ptr.vmem [resolvable:$true] %s25_s22 }
   0x4   :  { %s883_s23 = scalar_lea.vmem %s26_s22, 1024  ;;  %p888_p1 = scmp.lt.s32.totalorder %s26_s22, %s26_s22 }
   0x5   :  { %p884_p0 = scmp.ne.s32.totalorder %s26_s22, %s883_s23  ;;  %p889_p2 = scmp.lt.s32.totalorder %s883_s23, %s883_s23 }
   0x7   :  { %p890_p3 = por %p889_p2, %p888_p1 }
   0x9   :  { %p891_p4 = pnand %p890_p3, %p884_p0 }
   0xb   :  { %894 = shalt.err (!%p891_p4)
}
   0xc   :  { %s942_s24 = smov 128   ;;  %s943_s25 = smov 8  }
   0xd   :  { %31 = dma.hbm_to_vmem [thread:$0]  %s1227_s3, 1024, %s26_s22, [#allocation3], %s942_s24, %s942_s24, %s943_s25  }
   0xe   :  { %s944_s28 = smov [#allocation5]  }
   0xf   :  { %s37_s29 = sshll.u32 %s944_s28, 4  ;;  %s38_s29 = int_to_ptr.vmem [resolvable:$true] %s37_s29 }
  0x10   :  { %s903_s30 = scalar_lea.vmem %s38_s29, 1024  ;;  %p908_p6 = scmp.lt.s32.totalorder %s38_s29, %s38_s29 }
  0x11   :  { %p904_p5 = scmp.ne.s32.totalorder %s38_s29, %s903_s30  ;;  %p909_p7 = scmp.lt.s32.totalorder %s903_s30, %s903_s30 }
  0x13   :  { %p910_p8 = por %p909_p7, %p908_p6 }
  0x15   :  { %p911_p9 = pnand %p910_p8, %p904_p5 }
  0x17   :  { %914 = shalt.err (!%p911_p9)
}
  0x18   :  { %s945_s7 = smov 64   ;;  %s946_s8 = smov 4  }
  0x19   :  { %43 = dma.hbm_to_vmem [thread:$0]  %s1228_s4, 1024, %s38_s29, [#allocation6], %s945_s7, %s945_s7, %s946_s8  }
  0x1a   :  { %935 = dma.done.wait [#allocation3], 1024  }
  0x1b   :  { %936 = vsyncadd [#allocation3], 4294966272 }
  0x1c   :  { %937 = dma.done.wait [#allocation6], 1024  }
  0x1d   :  { %938 = vsyncadd [#allocation6], 4294966272  ;;  %v998_v0 = vld [vmem:[%s1224_s0 + $0x18] sm:$0xf]  ;;  %v1003_v1 = vld [vmem:[%s1224_s0 + $0x1c] sm:$0xf] }
  0x1e   :  { %v1008_v2 = vld [vmem:[%s1224_s0 + $0x20] sm:$0x3]  ;;  %vm97_vm0 = vsmask.f32 7424  ;;  %v1012_v3 = vcombine.low %v998_v0, %v1003_v1  ;;  %vm154_vm1 = vcmask 1046528   ;;  %v857_v7 = vld [vmem:[%s1225_s1 + $0x38] sm:$0xff]  }
  0x1f   :  { %v1016_v4 = vcombine.low %v1008_v2, %v1008_v2  ;;  %v1021_v5 = vld [vmem:[%s1224_s0] sm:$0xf]  ;;  %v1026_v6 = vld [vmem:[%s1224_s0 + $0x4] sm:$0xf]  ;;  %v1034_v8 = vld [vmem:[%s1224_s0 + $0x8] sm:$0x3]  ;;  %794 = vmatprep.subr.bf16.mxu1 %v857_v7 }
  0x20   :  { %v1038_v9 = vcombine.low %v1021_v5, %v1026_v6  ;;  %v1043_v10 = vld [vmem:[%s1224_s0 + $0xc] sm:$0xf]  ;;  %v1048_v11 = vld [vmem:[%s1224_s0 + $0x10] sm:$0xf]  ;;  %v161_v12 = vrot.slane %v1012_v3, 1  ;;  %v1054_v14 = vcombine.low %v1034_v8, %v1034_v8  ;;  %v289_v18 = vrot.slane %v1008_v2, 6  ;;  %795 = vmatpush3.bf16.msra.mxu1 %v857_v7 }
  0x21   :  { %v162_v13 = vrot.slane %v1016_v4, 1  ;;  %v1059_v15 = vld [vmem:[%s1224_s0 + $0x14] sm:$0x3]  ;;  %v1063_v16 = vcombine.low %v1043_v10, %v1048_v11  ;;  %v1068_v17 = vld [vmem:[%s1224_s0 + $0x24] sm:$0xf]  ;;  %v859_v29 = vld [vmem:[%s1225_s1 + $0x28] sm:$0xff]  }
  0x22   :  { %v155_v19 = vrot.slane %v1038_v9, 1  ;;  %v721_v20 = vcombine.low %v1059_v15, %v1059_v15  ;;  %v99_v21 = vshrl.u32 %v1038_v9, 16  ;;  %v1078_v22 = vld [vmem:[%s1224_s0 + $0x28] sm:$0xf]  ;;  %v858_v23 = vld [vmem:[%s1225_s1 + $0x30] sm:$0xff]   ;;  %v156_v25 = vrot.slane %v1054_v14, 1 }
  0x23   :  { %v163_v24 = vsel %vm154_vm1, %v161_v12, %v162_v13  ;;  %v158_v26 = vrot.slane %v1063_v16, 1  ;;  %v101_v27 = vshll.u32 %v1038_v9, 16  ;;  %v1090_v28 = vld [vmem:[%s1224_s0 + $0x2c] sm:$0x3]  ;;  %vm175_vm2 = vsmask.f32 6400  ;;  %796 = vmatprep.subr.bf16.mxu1 %v858_v23 }
  0x24   :  { %171 = vrot.lane.b32.xlu0 %v163_v24, %s945_s7  ;;  %v159_v30 = vrot.slane %v721_v20, 1  ;;  %v106_v31 = vshll.u32 %v1054_v14, 16  ;;  %v1099_v32 = vcombine.low %v1068_v17, %v1078_v22  ;;  %v1103_v33 = vcombine.low %v1090_v28, %v1090_v28  ;;  %797 = vmatpush3.bf16.msra.mxu1 %v858_v23  ;;  %v862_v46 = vld [vmem:[%s1226_s2 + $0x8] sm:$0xff]   ;;  %v860_v51 = vld [vmem:[%s1225_s1 + $0x20] sm:$0xff]   ;;  %s947_s19 = smov 32   ;;  %s951_s28 = smov [#allocation7]  }
  0x25   :  { %v157_v34 = vsel %vm154_vm1, %v155_v19, %v156_v25  ;;  %v282_v35 = vrot.slane %v1059_v15, 6  ;;  %v103_v36 = vrot.slane %v101_v27, 1  ;;  %v111_v37 = vshrl.u32 %v1063_v16, 16  ;;  %798 = vmatprep.subr.bf16.mxu1 %v859_v29  ;;  %782 = vmatprep.subr.bf16.mxu0 %v862_v46  ;;  %v864_v56 = vld [vmem:[%s1226_s2] sm:$0xff]   ;;  %s706_s29 = sshll.u32 %s951_s28, 4  ;;  %s707_s29 = int_to_ptr.vmem [resolvable:$true] %s706_s29 }
  0x26   :  { %167 = vrot.lane.b32.xlu1 %v157_v34, %s945_s7  ;;  %v160_v38 = vsel %vm154_vm1, %v158_v26, %v159_v30  ;;  %v108_v39 = vrot.slane %v106_v31, 1  ;;  %v164_v40 = vrot.slane %v1099_v32, 1  ;;  %v165_v41 = vrot.slane %v1103_v33, 1  ;;  %783 = vmatpush3.bf16.msra.mxu0 %v862_v46  ;;  %s915_s30 = scalar_lea.vmem %s707_s29, 64  ;;  %p920_p11 = scmp.lt.s32.totalorder %s707_s29, %s707_s29 }
  0x27   :  { %v104_v42 = vor.u32 %v103_v36, %v99_v21  ;;  %v113_v43 = vshll.u32 %v1063_v16, 16  ;;  %v118_v44 = vshll.u32 %v721_v20, 16  ;;  %v185_v45 = vrot.slane %v111_v37, 1  ;;  %784 = vmatprep.subr.bf16.mxu0 %v864_v56  ;;  %p916_p10 = scmp.ne.s32.totalorder %s707_s29, %s915_s30  ;;  %p921_p12 = scmp.lt.s32.totalorder %s915_s30, %s915_s30 }
  0x28   :  { %vm267_vm3 = vcmask 1041408   ;;  %vm268_vm4 = vcmask 1045508   ;;  %v166_v47 = vsel %vm154_vm1, %v164_v40, %v165_v41  ;;  %v188_v48 = vshrl.u32 %v721_v20, 16  ;;  %799 = vmatpush3.bf16.msra.mxu1 %v859_v29 }
  0x29   :  { %v176_v49 = vrot.slane %v99_v21, 1  ;;  %v177_v50 = vrot.slane %v101_v27, 2  ;;  %v109_v52 = vsel %vm97_vm0, %v104_v42, %v108_v39  ;;  %v115_v53 = vrot.slane %v113_v43, 1  ;;  %800 = vmatprep.subr.bf16.mxu1 %v860_v51  ;;  %v861_v21 = vld [vmem:[%s1225_s1 + $0x18] sm:$0xff]   ;;  %vm1151_vm6 = vmor %vm267_vm3, %vm268_vm4  ;;  %p922_p13 = por %p921_p12, %p920_p11 }
  0x2a   :  { %v120_v54 = vrot.slane %v118_v44, 1  ;;  %v186_v55 = vrot.slane %v113_v43, 2  ;;  %169 = vrot.lane.b32.xlu1 %v160_v38, %s945_s7  ;;  %146 = vrot.lane.b32.xlu0 %v109_v52, %s947_s19  ;;  %v190_v57 = vrot.slane %v188_v48, 1  ;;  %v191_v58 = vrot.slane %v118_v44, 2 }
  0x2b   :  { %v178_v59 = vor.u32 %v177_v50, %v176_v49  ;;  %v179_v60 = vshrl.u32 %v1054_v14, 16  ;;  %v116_v61 = vor.u32 %v115_v53, %v111_v37  ;;  %v182_v63 = vrot.slane %v106_v31, 2  ;;  %v863_v31 = vld [vmem:[%s1225_s1 + $0x10] sm:$0xff]   ;;  %785 = vmatpush3.bf16.msra.mxu0 %v864_v56  ;;  %p923_p0 = pnand %p922_p13, %p916_p10 }
  0x2c   :  { %v187_v62 = vor.u32 %v186_v55, %v185_v45  ;;  %v135_v7 = vshrl.u32 %v1099_v32, 16  ;;  %v192_v12 = vor.u32 %v191_v58, %v190_v57  ;;  %v137_v19 = vshll.u32 %v1099_v32, 16  ;;  %801 = vmatpush3.bf16.msra.mxu1 %v860_v51 }
  0x2d   :  { %v181_v13 = vrot.slane %v179_v60, 1  ;;  %v142_v20 = vshll.u32 %v1103_v33, 16  ;;  %v121_v14 = vsel %vm97_vm0, %v116_v61, %v120_v54  ;;  %v123_v23 = vshrl.u32 %v1012_v3, 16  ;;  %802 = vmatprep.subr.bf16.mxu1 %v861_v21 }
  0x2e   :  { %v125_v24 = vshll.u32 %v1012_v3, 16  ;;  %v130_v25 = vshll.u32 %v1016_v4, 16  ;;  %173 = vrot.lane.b32.xlu1 %v166_v47, %s945_s7  ;;  %148 = vrot.lane.b32.xlu0 %v121_v14, %s947_s19  ;;  %v193_v26 = vsel %vm175_vm2, %v187_v62, %v192_v12  ;;  %v139_v29 = vrot.slane %v137_v19, 1  ;;  %s948_s7 = smov 96  }
  0x2f   :  { %v183_v27 = vor.u32 %v182_v63, %v181_v13  ;;  %v144_v30 = vrot.slane %v142_v20, 1  ;;  %v203_v37 = vrot.slane %v135_v7, 1  ;;  %v204_v38 = vrot.slane %v137_v19, 2 }
  0x30   :  { %v127_v34 = vrot.slane %v125_v24, 1  ;;  %v132_v36 = vrot.slane %v130_v25, 1  ;;  %v140_v40 = vor.u32 %v139_v29, %v135_v7  ;;  %v206_v41 = vshrl.u32 %v1103_v33, 16  ;;  %803 = vmatpush3.bf16.msra.mxu1 %v861_v21  ;;  %v870_v33 = vld [vmem:[#allocation5 + $0x20] sm:$0xff]  }
  0x31   :  { %v184_v39 = vsel %vm175_vm2, %v178_v59, %v183_v27  ;;  %v209_v42 = vrot.slane %v142_v20, 2  ;;  %v205_v44 = vor.u32 %v204_v38, %v203_v37  ;;  %v194_v45 = vrot.slane %v123_v23, 1  ;;  %804 = vmatprep.subr.bf16.mxu1 %v863_v31 }
  0x32   :  { %v128_v43 = vor.u32 %v127_v34, %v123_v23  ;;  %v195_v46 = vrot.slane %v125_v24, 2  ;;  %214 = vrot.lane.b32.xlu1 %v193_v26, %s948_s7  ;;  %212 = vrot.lane.b32.xlu0 %v184_v39, %s948_s7  ;;  %v145_v47 = vsel %vm97_vm0, %v140_v40, %v144_v30  ;;  %v208_v48 = vrot.slane %v206_v41, 1 }
  0x33   :  { %v197_v49 = vshrl.u32 %v1016_v4, 16  ;;  %v200_v50 = vrot.slane %v130_v25, 2  ;;  %vm220_vm5 = vcmask 261120   ;;  %v724_v53 = vrot.slane %v1021_v5, 10  ;;  %v865_v4 = vld [vmem:[%s1225_s1 + $0x8] sm:$0xff]  }
  0x34   :  { %v133_v51 = vsel %vm97_vm0, %v128_v43, %v132_v36  ;;  %v196_v52 = vor.u32 %v195_v46, %v194_v45  ;;  %v272_v54 = vrot.slane %v1026_v6, 6  ;;  %v210_v55 = vor.u32 %v209_v42, %v208_v48  ;;  %805 = vmatpush3.bf16.msra.mxu1 %v863_v31 }
  0x35   :  { %v199_v56 = vrot.slane %v197_v49, 1  ;;  %v275_v57 = vrot.slane %v1034_v8, 6  ;;  %v725_v58 = vrot.slane %v1043_v10, 10  ;;  %v296_v59 = vrot.slane %v1090_v28, 6  ;;  %806 = vmatprep.subr.bf16.mxu1 %v865_v4 }
  0x36   :  { %v273_v60 = vsel %vm1151_vm6, %v724_v53, %v272_v54  ;;  %v274_v61 = vrot.slane %v272_v54, 4  ;;  %v279_v5 = vrot.slane %v1048_v11, 6  ;;  %152 = vrot.lane.b32.xlu1 %v145_v47, %s947_s19  ;;  %150 = vrot.lane.b32.xlu0 %v133_v51, %s947_s19  ;;  %v726_v62 = vrot.slane %v998_v0, 10  ;;  %v866_v0 = vld [vmem:[%s1225_s1] sm:$0xff]   ;;  %v871_v51 = vld [vmem:[#allocation5 + $0x18] sm:$0xff]   ;;  %v873_v53 = vld [vmem:[#allocation5 + $0x8] sm:$0xff]  }
  0x37   :  { %v201_v6 = vor.u32 %v200_v50, %v199_v56  ;;  %v286_v63 = vrot.slane %v1003_v1, 6  ;;  %v211_v8 = vsel %vm175_vm2, %v205_v44, %v210_v55  ;;  %v727_v20 = vrot.slane %v1068_v17, 10  ;;  %v867_v50 = vld [vmem:[#allocation5 + $0x38] sm:$0xff]   ;;  %v874_v54 = vld [vmem:[#allocation5] sm:$0xff]  }
  0x38   :  { %v276_v10 = vsel %vm1151_vm6, %v274_v61, %v275_v57  ;;  %v280_v28 = vsel %vm1151_vm6, %v725_v58, %v279_v5  ;;  %v281_v7 = vrot.slane %v279_v5, 4  ;;  %v293_v21 = vrot.slane %v1078_v22, 6  ;;  %807 = vmatpush3.bf16.msra.mxu1 %v865_v4 }
  0x39   :  { %v202_v11 = vsel %vm175_vm2, %v196_v52, %v201_v6  ;;  %v728_v12 = vcombine.low %v273_v60, %v276_v10  ;;  %v287_v1 = vsel %vm1151_vm6, %v726_v62, %v286_v63  ;;  %v288_v13 = vrot.slane %v286_v63, 4  ;;  %808 = vmatprep.subr.bf16.mxu1 %v866_v0  ;;  %v872_v52 = vld [vmem:[#allocation5 + $0x10] sm:$0xff]   ;;  %v516_v62 = vld [vmem:[#allocation2] sm:$0xff] }
  0x3a   :  { %v283_v19 = vsel %vm1151_vm6, %v281_v7, %v282_v35  ;;  %218 = vrot.lane.b32.xlu1 %v211_v8, %s948_s7  ;;  %216 = vrot.lane.b32.xlu0 %v202_v11, %s948_s7  ;;  %v295_v24 = vrot.slane %v293_v21, 4  ;;  %v294_v17 = vsel %vm1151_vm6, %v727_v20, %v293_v21  ;;  %vm229_vm7 = vcmask 523264   ;;  %v518_v60 = vld [vmem:[#allocation2 + $0x10] sm:$0xff]  ;;  %v519_v8 = vld [vmem:[#allocation2 + $0x18] sm:$0xff] }
  0x3b   :  { %v729_v14 = vcombine.low %v280_v28, %v283_v19  ;;  %v290_v23 = vsel %vm1151_vm6, %v288_v13, %v289_v18  ;;  %786 = vmatprep.mubr.msk.bf16.mxu0 %vm220_vm5, %v728_v12  ;;  %vm238_vm8 = vcmask 785408   ;;  %v949_v49 = vmov 0.0   ;;  %v517_v12 = vld [vmem:[#allocation2 + $0x8] sm:$0xff] }
  0x3c   :  { %v730_v15 = vcombine.low %v287_v1, %v290_v23  ;;  %v297_v22 = vsel %vm1151_vm6, %v295_v24, %v296_v59  ;;  %809 = vmatpush3.bf16.msra.mxu1 %v866_v0  ;;  %818 = vmatprep.subr.bf16.mxu0 %v949_v49  ;;  %vm950_vm9 = vmmov 0   ;;  %vm603_vm10 = vcmask 1041409  }
  0x3d   :  { %787 = vmatmul.mubr.msk.bf16.vlgmr.msra.gmra.mxu0 %vm220_vm5, %v729_v14  ;;  %v731_v2 = vcombine.low %v294_v17, %v297_v22  ;;  %vm605_vm11 = vcmask 1042434   ;;  %vm607_vm12 = vcmask 1043459  }
  0x3e   :  { %790 = vmatprep.mubr.msk.bf16.mxu0 %vm220_vm5, %v730_v15  ;;  %819 = vmatpush3.bf16.msra.mxu0 %v867_v50 }
  0x3f   :  { %820 = vmatprep.subr.bf16.mxu0 %v949_v49 }
  0x45   :  { %791 = vmatmul.mubr.msk.bf16.gmra.mxu0 %vm220_vm5, %v731_v2 }
  0x46   :  { %834 = vmatprep.mubr.msk.bf16.mxu0 %vm950_vm9, %v949_v49 }
  0x96   :  { %v172_v18 = vpop.permute.xlu0 %171 }
  0x98   :  { %v168_v35 = vpop.permute.xlu1 %167 }
  0x9c   :  { %v170_v25 = vpop.permute.xlu1 %169  ;;  %v147_v26 = vpop.permute.xlu0 %146 }
  0x9d   :  { %v222_v30 = vsel %vm220_vm5, %v1038_v9, %v147_v26 }
  0x9e   :  { %v231_v37 = vsel %vm229_vm7, %v222_v30, %v168_v35  ;;  %v523_v30 = vld [vmem:[#allocation2 + $0x38] sm:$0xff] }
  0xa0   :  { %v174_v27 = vpop.permute.xlu1 %173  ;;  %v149_v29 = vpop.permute.xlu0 %148 }
  0xa1   :  { %v224_v31 = vsel %vm220_vm5, %v1063_v16, %v149_v29 }
  0xa2   :  { %v233_v38 = vsel %vm229_vm7, %v224_v31, %v170_v25  ;;  %v520_v25 = vld [vmem:[#allocation2 + $0x20] sm:$0xff] }
  0xa4   :  { %v215_v34 = vpop.permute.xlu1 %214  ;;  %v213_v36 = vpop.permute.xlu0 %212 }
  0xa5   :  { %v240_v39 = vsel %vm238_vm8, %v231_v37, %v213_v36  ;;  %v243_v40 = vsel %vm238_vm8, %v233_v38, %v215_v34  ;;  %v521_v38 = vld [vmem:[#allocation2 + $0x28] sm:$0xff] }
  0xa6   :  { %810 = vmatprep.mubr.bf16.mxu1 %v240_v39 }
  0xa7   :  { %811 = vmatmul.mubr.bf16.vlgmr.msra.gmra.mxu1 %v243_v40 }
  0xa8   :  { %v153_v41 = vpop.permute.xlu1 %152  ;;  %v151_v42 = vpop.permute.xlu0 %150 }
  0xa9   :  { %v228_v9 = vsel %vm220_vm5, %v1099_v32, %v153_v41  ;;  %v226_v16 = vsel %vm220_vm5, %v1012_v3, %v151_v42  ;;  %v868_v32 = vld [vmem:[#allocation5 + $0x30] sm:$0xff]   ;;  %v869_v3 = vld [vmem:[#allocation5 + $0x28] sm:$0xff]  }
  0xaa   :  { %v235_v45 = vsel %vm229_vm7, %v226_v16, %v172_v18  ;;  %v237_v46 = vsel %vm229_vm7, %v228_v9, %v174_v27  ;;  %821 = vmatpush3.bf16.msra.mxu0 %v868_v32  ;;  %v522_v18 = vld [vmem:[#allocation2 + $0x30] sm:$0xff] }
  0xab   :  { %822 = vmatprep.subr.bf16.mxu0 %v949_v49 }
  0xac   :  { %v219_v43 = vpop.permute.xlu1 %218  ;;  %v217_v44 = vpop.permute.xlu0 %216 }
  0xad   :  { %v246_v47 = vsel %vm238_vm8, %v235_v45, %v217_v44  ;;  %v249_v48 = vsel %vm238_vm8, %v237_v46, %v219_v43 }
  0xae   :  { %814 = vmatprep.mubr.bf16.mxu1 %v246_v47  ;;  %823 = vmatpush3.bf16.msra.mxu0 %v869_v3 }
  0xaf   :  { %815 = vmatmul.mubr.bf16.gmra.mxu1 %v249_v48  ;;  %824 = vmatprep.subr.bf16.mxu0 %v949_v49 }
  0xb2   :  { %825 = vmatpush3.bf16.msra.mxu0 %v870_v33 }
  0xb3   :  { %826 = vmatprep.subr.bf16.mxu0 %v949_v49 }
  0xb6   :  { %827 = vmatpush3.bf16.msra.mxu0 %v871_v51 }
  0xb7   :  { %828 = vmatprep.subr.bf16.mxu0 %v949_v49 }
  0xba   :  { %829 = vmatpush3.bf16.msra.mxu0 %v872_v52 }
  0xbb   :  { %830 = vmatprep.subr.bf16.mxu0 %v949_v49 }
  0xbe   :  { %831 = vmatpush3.bf16.msra.mxu0 %v873_v53 }
  0xbf   :  { %832 = vmatprep.subr.bf16.mxu0 %v949_v49 }
  0xc2   :  { %833 = vmatpush3.bf16.msra.mxu0 %v874_v54 }
  0xfd   :  { %v788_v55 = vpop.f32.mrf.mxu0 }
  0xff   :  { %v372_v56 = vpop.f32.mrf.mxu0 }
 0x101   :  { %v789_v4 = vpop.f32.mrf.mxu0 }
 0x103   :  { %v375_v57 = vpop.f32.mrf.mxu0 }
 0x105   :  { %v792_v61 = vpop.f32.mrf.mxu0 }
 0x107   :  { %v388_v7 = vpop.f32.mrf.mxu0 }
 0x109   :  { %v793_v23 = vpop.f32.mrf.mxu0 }
 0x10b   :  { %v391_v31 = vpop.f32.mrf.mxu0 }
 0x167   :  { %v812_v58 = vpop.f32.mrf.mxu1 }
 0x168   :  { %v494_v59 = vadd.f32 %v812_v58, %v788_v55 }
 0x169   :  { %v485_v5 = vpop.f32.mrf.mxu1 }
 0x16a   :  { %v486_v6 = vadd.f32 %v485_v5, %v372_v56  ;;  %v526_v10 = vadd.f32 %v518_v60, %v494_v59 }
 0x16b   :  { %v813_v63 = vpop.f32.mrf.mxu1 }
 0x16c   :  { %v497_v28 = vadd.f32 %v813_v63, %v789_v4  ;;  %v524_v0 = vadd.f32 %v516_v62, %v486_v6  ;;  %v534_v20 = vmax.f32 %v526_v10, 0.0 }
 0x16d   :  { %v488_v11 = vpop.f32.mrf.mxu1 }
 0x16e   :  { %v527_v1 = vadd.f32 %v519_v8, %v497_v28  ;;  %v489_v13 = vadd.f32 %v488_v11, %v375_v57  ;;  %v532_v17 = vmax.f32 %v524_v0, 0.0 }
 0x16f   :  { %v816_v19 = vpop.f32.mrf.mxu1 }
 0x170   :  { %v535_v21 = vmax.f32 %v527_v1, 0.0  ;;  %v525_v14 = vadd.f32 %v517_v12, %v489_v13  ;;  %v510_v15 = vadd.f32 %v816_v19, %v792_v61 }
 0x171   :  { %v501_v24 = vpop.f32.mrf.mxu1 }
 0x172   :  { %v547_v22 = vmax.f32 %v534_v20, %v535_v21  ;;  %v533_v2 = vmax.f32 %v525_v14, 0.0  ;;  %v502_v35 = vadd.f32 %v501_v24, %v388_v7  ;;  %v530_v34 = vadd.f32 %v522_v18, %v510_v15  ;;  %v746_v14 = vld [vmem:[%s1229_s5] ss:$0 sm:$0xff] }
 0x173   :  { %v817_v26 = vpop.f32.mrf.mxu1 }
 0x174   :  { %v548_v27 = vrot.slane %v547_v22, 4  ;;  %v540_v29 = vmax.f32 %v532_v17, %v533_v2  ;;  %v513_v36 = vadd.f32 %v817_v26, %v793_v23  ;;  %v528_v41 = vadd.f32 %v520_v25, %v502_v35 }
 0x175   :  { %v504_v37 = vpop.f32.mrf.mxu1  ;;  %v538_v45 = vmax.f32 %v530_v34, 0.0 }
 0x176   :  { %v549_v39 = vmax.f32 %v547_v22, %v548_v27  ;;  %v541_v40 = vrot.slane %v540_v29, 4  ;;  %v505_v42 = vadd.f32 %v504_v37, %v391_v31  ;;  %v531_v9 = vadd.f32 %v523_v30, %v513_v36 }
 0x177   :  { %v536_v48 = vmax.f32 %v528_v41, 0.0 }
 0x178   :  { %v550_v16 = vrot.slane %v549_v39, 2  ;;  %v542_v43 = vmax.f32 %v540_v29, %v541_v40  ;;  %v529_v44 = vadd.f32 %v521_v38, %v505_v42  ;;  %v539_v46 = vmax.f32 %v531_v9, 0.0 }
 0x17a   :  { %v543_v47 = vrot.slane %v542_v43, 2  ;;  %v537_v49 = vmax.f32 %v529_v44, 0.0  ;;  %v551_v50 = vmax.f32 %v549_v39, %v550_v16  ;;  %v561_v32 = vmax.f32 %v538_v45, %v539_v46 }
 0x17c   :  { %v544_v3 = vmax.f32 %v542_v43, %v543_v47  ;;  %v554_v33 = vmax.f32 %v536_v48, %v537_v49  ;;  %v562_v51 = vrot.slane %v561_v32, 4  ;;  %v552_v54 = vrot.slane %v551_v50, 1 }
 0x17e   :  { %v545_v52 = vrot.slane %v544_v3, 1  ;;  %v555_v53 = vrot.slane %v554_v33, 4  ;;  %v563_v55 = vmax.f32 %v561_v32, %v562_v51  ;;  %v553_v59 = vmax.f32 %v551_v50, %v552_v54 }
 0x180   :  { %v556_v56 = vmax.f32 %v554_v33, %v555_v53  ;;  %v546_v4 = vmax.f32 %v544_v3, %v545_v52  ;;  %v564_v57 = vrot.slane %v563_v55, 2  ;;  %v569_v63 = vpack.c.bf16 %v553_v59, %v553_v59 }
 0x182   :  { %v557_v58 = vrot.slane %v556_v56, 2  ;;  %v565_v60 = vmax.f32 %v563_v55, %v564_v57  ;;  %v568_v5 = vpack.c.bf16 %v546_v4, %v546_v4  ;;  %v600_v12 = vunpack.c.l.b16 %v569_v63 }
 0x184   :  { %v558_v61 = vmax.f32 %v556_v56, %v557_v58  ;;  %v566_v6 = vrot.slane %v565_v60, 1  ;;  %v599_v28 = vunpack.c.l.b16 %v568_v5 }
 0x186   :  { %v559_v62 = vrot.slane %v558_v61, 1  ;;  %v567_v8 = vmax.f32 %v565_v60, %v566_v6  ;;  %v604_v1 = vsel %vm603_vm10, %v600_v12, %v599_v28 }
 0x188   :  { %v560_v10 = vmax.f32 %v558_v61, %v559_v62  ;;  %v571_v7 = vpack.c.bf16 %v567_v8, %v567_v8 }
 0x18a   :  { %v570_v11 = vpack.c.bf16 %v560_v10, %v560_v10  ;;  %v602_v13 = vunpack.c.l.b16 %v571_v7 }
 0x18c   :  { %v601_v0 = vunpack.c.l.b16 %v570_v11 }
 0x18e   :  { %v606_v19 = vsel %vm605_vm11, %v601_v0, %v604_v1 }
 0x18f   :  { %v608_v20 = vsel %vm607_vm12, %v602_v13, %v606_v19 }
 0x190   :  { %v609_v21 = vpack.c.b16 %v608_v20, %v608_v20 }
 0x192   :  { %835 = vmatmul.mubr.bf16.vlgmr.msra.gmra.mxu0 %v609_v21 }
 0x252   :  { %v693_v23 = vpop.f32.mrf.mxu0 }
 0x253   :  { %v694_v15 = vadd.f32 %v746_v14, %v693_v23 }
 0x254   :  { %v836_v24 = vpop.f32.mrf.mxu0 }
 0x255   :  { %699 = vst [vmem:[#allocation7] sm:$0xf] %v694_v15 }
 0x256   :  { %v696_v17 = vpop.f32.mrf.mxu0 }
 0x257   :  { %926 = shalt.err (!%p923_p0)
}
 0x258   :  { %709 = dma.vmem_to_hbm [thread:$0]  %s707_s29, 64, %s1230_s6, [#allocation4]   ;;  %v837_v22 = vpop.f32.mrf.mxu0 }
 0x259   :  { %939 = dma.done.wait [#allocation4], 64  }
 0x25a   :  { %940 = vsyncadd [#allocation4], 4294967232 }
 0x25b   :  { %713 = vsyncpa [#allocation3], 1 }
 0x25c   :  { %714 = vsyncpa [#allocation6], 1 }
 0x25d   :  { %715 = vsyncpa [#allocation4], 1 }

</bundles_post_ra>
